<compile_context>
chip_gen: v6e
topology: v6e:2x2x1
jax: 0.10.0
libtpu: 0.0.40
codegen_flags: <defaults>
</compile_context>

<pallas_src>
import jax
import jax.numpy as jnp
import numpy as np
from jax.experimental import pallas as pl
from jax.experimental.pallas import tpu as pltpu


# ----------------------------------------------------------------------------
# Pallas kernel: one batch element (T rows) per grid step.
# ----------------------------------------------------------------------------
def _diffgan_g_kernel(x_ref, y_ref, hz_ref,
                      wa_ref, wt_ref, w1_ref, w2_ref, wd_ref,
                      bh_ref, bd_ref,
                      out_ref):
    f32 = jnp.float32
    bf16 = jnp.bfloat16

    x = x_ref[0]                      # (T, F)  bf16
    y = y_ref[0]                      # (T, E)  bf16
    hz = hz_ref[...][0:1, :]          # (1, Hp) f32  (replicated rows -> take one)

    bh = bh_ref[...]                  # (4, Hp) f32 packed biases
    ba, bt, b1, b2 = bh[0:1, :], bh[1:2, :], bh[2:3, :], bh[3:4, :]

    # Per-timestep encoders (Conv1d kernel=1 == per-row matmul), bf16 in / f32 acc.
    h_a = jnp.dot(x, wa_ref[...], preferred_element_type=f32) + ba
    h_t = jnp.dot(y, wt_ref[...], preferred_element_type=f32) + bt
    h = jnp.maximum(h_a, 0.0) + jnp.maximum(h_t, 0.0) + hz       # (T, Hp) f32

    T = h.shape[0]
    # (T, 1) boundary masks; with the grid over N, row index == time index.
    row = jax.lax.broadcasted_iota(jnp.int32, (T, 1), 0)
    is_first = row == 0
    is_last = row == (T - 1)

    def conv_block(hin, w_ref, b):
        # k=3 temporal conv, zero-padded at the batch-element boundaries.
        # Neighbors via XLU rolls (positive shifts only); wrap rows masked off.
        prev = jnp.where(is_first, 0.0, pltpu.roll(hin, shift=1, axis=0))
        nxt = jnp.where(is_last, 0.0, pltpu.roll(hin, shift=T - 1, axis=0))
        acc = (jnp.dot(prev.astype(bf16), w_ref[0], preferred_element_type=f32)
               + jnp.dot(hin.astype(bf16), w_ref[1], preferred_element_type=f32)
               + jnp.dot(nxt.astype(bf16), w_ref[2], preferred_element_type=f32)
               + b)
        return jnp.maximum(acc, 0.0)

    h = conv_block(h, w1_ref, b1)     # "unet.conv1"-style block
    h = conv_block(h, w2_ref, b2)     # "unet.conv2"-style block

    # Decoder: (T, Hp) @ (Hp, Op), lane-dense padded output.
    out = jnp.dot(h.astype(bf16), wd_ref[...], preferred_element_type=f32) + bd_ref[...]
    out_ref[0] = out.astype(out_ref.dtype)


# ----------------------------------------------------------------------------
# One-time parameter preprocessing (padding, stacking, dtype casts).
# ----------------------------------------------------------------------------
def prepare_params(params, *, lane=128):
    f32 = jnp.float32
    bf16 = jnp.bfloat16
    F, H = params["wa"].shape
    E = params["wt"].shape[0]
    Nd = params["wn"].shape[0]
    O = params["wd"].shape[1]
    Hp = ((H + lane - 1) // lane) * lane
    Op = ((O + lane - 1) // lane) * lane

    def pad_cols(w, cols):
        return jnp.pad(w, ((0, 0), (0, cols - w.shape[1])))

    def pad_rc(w, rows, cols):
        return jnp.pad(w, ((0, rows - w.shape[0]), (0, cols - w.shape[1])))

    w1 = jnp.stack([pad_rc(params["w1p"], Hp, Hp),
                    pad_rc(params["w1c"], Hp, Hp),
                    pad_rc(params["w1n"], Hp, Hp)], axis=0).astype(bf16)
    w2 = jnp.stack([pad_rc(params["w2p"], Hp, Hp),
                    pad_rc(params["w2c"], Hp, Hp),
                    pad_rc(params["w2n"], Hp, Hp)], axis=0).astype(bf16)
    bias_h = jnp.concatenate([pad_cols(params["ba"], Hp),
                              pad_cols(params["bt"], Hp),
                              pad_cols(params["b1"], Hp),
                              pad_cols(params["b2"], Hp)], axis=0).astype(f32)

    return dict(
        wa=pad_cols(params["wa"], Hp).astype(bf16),       # (F, Hp)
        wt=pad_cols(params["wt"], Hp).astype(bf16),       # (E, Hp)
        wn=pad_cols(params["wn"], Hp).astype(f32),        # (Nd, Hp) — XLA-side noise proj
        w1=w1, w2=w2,                                     # (3, Hp, Hp) bf16 each
        wd=pad_rc(params["wd"], Hp, Op).astype(bf16),     # (Hp, Op)
        bias_h=bias_h,                                    # (4, Hp) f32
        bd=pad_cols(params["bd"], Op).astype(f32),        # (1, Op)
        F=F, E=E, Nd=Nd, H=H, Hp=Hp, O=O, Op=Op,
    )


# ----------------------------------------------------------------------------
# Wrapper: pallas_call with grid over the batch, weights VMEM-resident.
# ----------------------------------------------------------------------------
def diffgan_g_forward(x, y, prepared, time_steps=None, noise=None):
    """x: (N,T,F) audio; y: (N,T,E) text; noise: (N, Nd) or None.
    Returns (out (N,T,out_feats), internal_losses=[])."""
    del time_steps  # fixed time_steps in this synthetic generator
    f32 = jnp.float32
    bf16 = jnp.bfloat16

    N, T, F = x.shape
    E = y.shape[-1]
    Nd, Hp, O, Op = prepared["Nd"], prepared["Hp"], prepared["O"], prepared["Op"]

    if noise is None:
        noise = jnp.zeros((N, Nd), f32)

    # Noise projection in XLA: only N*Hp unique values; replicate to 8 sublanes
    # per batch element (sublane/lane-dense block) instead of a T-fold HBM copy.
    hz = noise.astype(f32) @ prepared["wn"]                                # (N, Hp)
    hz8 = jnp.broadcast_to(hz[:, None, :], (N, 8, Hp)).reshape(N * 8, Hp)  # (8N, Hp)

    xb = x.astype(bf16)
    yb = y.astype(bf16)

    const2 = lambda n: (0, 0)
    const3 = lambda n: (0, 0, 0)

    out_padded = pl.pallas_call(
        _diffgan_g_kernel,
        out_shape=jax.ShapeDtypeStruct((N, T, Op), f32),
        grid=(N,),
        in_specs=[
            pl.BlockSpec((1, T, F), lambda n: (n, 0, 0)),        # x, per-batch
            pl.BlockSpec((1, T, E), lambda n: (n, 0, 0)),        # y, per-batch
            pl.BlockSpec((8, Hp), lambda n: (n, 0)),             # hz, per-batch
            pl.BlockSpec(prepared["wa"].shape, const2),          # resident weights
            pl.BlockSpec(prepared["wt"].shape, const2),
            pl.BlockSpec(prepared["w1"].shape, const3),
            pl.BlockSpec(prepared["w2"].shape, const3),
            pl.BlockSpec(prepared["wd"].shape, const2),
            pl.BlockSpec(prepared["bias_h"].shape, const2),
            pl.BlockSpec(prepared["bd"].shape, const2),
        ],
        out_specs=pl.BlockSpec((1, T, Op), lambda n: (n, 0, 0)),
        compiler_params=pltpu.CompilerParams(
            dimension_semantics=("parallel",),
            vmem_limit_bytes=32 * 1024 * 1024,
        ),
    )(xb, yb, hz8,
      prepared["wa"], prepared["wt"], prepared["w1"], prepared["w2"],
      prepared["wd"], prepared["bias_h"], prepared["bd"])

    out = out_padded[:, :, :O]
    internal_losses = []
    return out, internal_losses


# ----------------------------------------------------------------------------
# Deterministic parameter init (synthetic, not a checkpoint load).
# ----------------------------------------------------------------------------
def init_params(key, F, E, Nd, H, O):
    ks = jax.random.split(key, 10)

    def lin(k, fan_in, shape):
        return (jax.random.normal(k, shape, jnp.float32) / jnp.sqrt(fan_in)).astype(jnp.float32)

    return dict(
        wa=lin(ks[0], F, (F, H)), ba=jnp.zeros((1, H), jnp.float32),
        wt=lin(ks[1], E, (E, H)), bt=jnp.zeros((1, H), jnp.float32),
        wn=lin(ks[2], Nd, (Nd, H)),
        w1p=lin(ks[3], 3 * H, (H, H)), w1c=lin(ks[4], 3 * H, (H, H)),
        w1n=lin(ks[5], 3 * H, (H, H)), b1=jnp.zeros((1, H), jnp.float32),
        w2p=lin(ks[6], 3 * H, (H, H)), w2c=lin(ks[7], 3 * H, (H, H)),
        w2n=lin(ks[8], 3 * H, (H, H)), b2=jnp.zeros((1, H), jnp.float32),
        wd=lin(ks[9], H, (H, O)), bd=jnp.zeros((1, O), jnp.float32),
    )


# ----------------------------------------------------------------------------
# Pure-JAX reference mirroring the kernel's numerics
# (bf16 matmul operands, f32 accumulation, 3-accumulate conv form).
# ----------------------------------------------------------------------------
def reference_forward(x, y, noise, p):
    bf16 = jnp.bfloat16

    def dot(a, b):
        return jnp.einsum("...k,kh->...h", a.astype(bf16), b.astype(bf16),
                          preferred_element_type=jnp.float32)

    hz = (noise @ p["wn"])[:, None, :]                      # (N, 1, H) f32
    h = (jnp.maximum(dot(x, p["wa"]) + p["ba"], 0.0)
         + jnp.maximum(dot(y, p["wt"]) + p["bt"], 0.0)
         + hz)

    def tconv(h, wp, wc, wn, b):
        prev = jnp.concatenate([jnp.zeros_like(h[:, :1]), h[:, :-1]], axis=1)
        nxt = jnp.concatenate([h[:, 1:], jnp.zeros_like(h[:, :1])], axis=1)
        acc = dot(prev, wp) + dot(h, wc) + dot(nxt, wn) + b
        return jnp.maximum(acc, 0.0)

    h = tconv(h, p["w1p"], p["w1c"], p["w1n"], p["b1"])
    h = tconv(h, p["w2p"], p["w2c"], p["w2n"], p["b2"])
    return dot(h, p["wd"]) + p["bd"]


if __name__ == "__main__":
    # Small shapes consistent with the module's documented interface.
    N, T = 2, 16          # batch, time steps
    F, E = 32, 32         # audio frequency bins, text embedding size
    Nd, H = 16, 64        # in_noise_dim, hidden channels (scaled-down in_channels)
    O = 104               # out_feats (pose features)

    key = jax.random.PRNGKey(0)
    kx, ky, kz, kp = jax.random.split(key, 4)
    x = jax.random.normal(kx, (N, T, F), jnp.float32)     # audio: (N, time, frequency)
    y = jax.random.normal(ky, (N, T, E), jnp.float32)     # text:  (N, time, embedding)
    noise = jax.random.normal(kz, (N, Nd), jnp.float32)   # noise: (N, in_noise_dim)

    params = init_params(kp, F, E, Nd, H, O)
    prepared = prepare_params(params)                     # one-time prepack

    out, internal_losses = diffgan_g_forward(x, y, prepared, time_steps=T, noise=noise)
    out = jax.block_until_ready(out)

    ref = jax.block_until_ready(reference_forward(x, y, noise, params))
    np.testing.assert_allclose(np.asarray(out), np.asarray(ref), rtol=1e-2, atol=1e-2)
    assert out.shape == (N, T, O)
    assert internal_losses == []

    print("KERNEL_OK")
</pallas_src>

<mosaic_0001>
module attributes {stable_mosaic.version = 11 : i64} {
  func.func @_diffgan_g_kernel(%arg0: i32, %arg1: memref<1x16x32xbf16, #tpu.memory_space<vmem>>, %arg2: memref<1x16x32xbf16, #tpu.memory_space<vmem>>, %arg3: memref<8x128xf32, #tpu.memory_space<vmem>>, %arg4: memref<32x128xbf16, #tpu.memory_space<vmem>>, %arg5: memref<32x128xbf16, #tpu.memory_space<vmem>>, %arg6: memref<3x128x128xbf16, #tpu.memory_space<vmem>>, %arg7: memref<3x128x128xbf16, #tpu.memory_space<vmem>>, %arg8: memref<128x128xbf16, #tpu.memory_space<vmem>>, %arg9: memref<4x128xf32, #tpu.memory_space<vmem>>, %arg10: memref<1x128xf32, #tpu.memory_space<vmem>>, %arg11: memref<1x16x128xf32, #tpu.memory_space<vmem>>) attributes {dimension_semantics = [#tpu.dimension_semantics<parallel>], iteration_bounds = array<i64: 2>, scalar_prefetch = 0 : i64, scratch_operands = 0 : i64, tpu.core_type = #tpu.core_type<tc>, window_params = [{transform_indices = @transform_0, window_bounds = array<i64: 1, 16, 32>}, {transform_indices = @transform_1, window_bounds = array<i64: 1, 16, 32>}, {transform_indices = @transform_2, window_bounds = array<i64: 8, 128>}, {pipeline_mode = #tpu.pipeline_mode<synchronous>, transform_indices = @transform_3, window_bounds = array<i64: 32, 128>}, {pipeline_mode = #tpu.pipeline_mode<synchronous>, transform_indices = @transform_4, window_bounds = array<i64: 32, 128>}, {pipeline_mode = #tpu.pipeline_mode<synchronous>, transform_indices = @transform_5, window_bounds = array<i64: 3, 128, 128>}, {pipeline_mode = #tpu.pipeline_mode<synchronous>, transform_indices = @transform_6, window_bounds = array<i64: 3, 128, 128>}, {pipeline_mode = #tpu.pipeline_mode<synchronous>, transform_indices = @transform_7, window_bounds = array<i64: 128, 128>}, {pipeline_mode = #tpu.pipeline_mode<synchronous>, transform_indices = @transform_8, window_bounds = array<i64: 4, 128>}, {pipeline_mode = #tpu.pipeline_mode<synchronous>, transform_indices = @transform_9, window_bounds = array<i64: 1, 128>}, {transform_indices = @transform_10, window_bounds = array<i64: 1, 16, 128>}]} {
    %c0 = arith.constant 0 : index
    %c0_0 = arith.constant 0 : index
    %c0_1 = arith.constant 0 : index
    %0 = vector.load %arg1[%c0, %c0_0, %c0_1] : memref<1x16x32xbf16, #tpu.memory_space<vmem>>, vector<1x16x32xbf16>
    %1 = vector.shape_cast %0 : vector<1x16x32xbf16> to vector<16x32xbf16>
    %c0_2 = arith.constant 0 : index
    %c0_3 = arith.constant 0 : index
    %c0_4 = arith.constant 0 : index
    %2 = vector.load %arg2[%c0_2, %c0_3, %c0_4] : memref<1x16x32xbf16, #tpu.memory_space<vmem>>, vector<1x16x32xbf16>
    %3 = vector.shape_cast %2 : vector<1x16x32xbf16> to vector<16x32xbf16>
    %c0_5 = arith.constant 0 : index
    %c0_6 = arith.constant 0 : index
    %4 = vector.load %arg3[%c0_5, %c0_6] : memref<8x128xf32, #tpu.memory_space<vmem>>, vector<8x128xf32>
    %5 = vector.extract_strided_slice %4 {offsets = [0, 0], sizes = [1, 128], strides = [1, 1]} : vector<8x128xf32> to vector<1x128xf32>
    %c0_7 = arith.constant 0 : index
    %c0_8 = arith.constant 0 : index
    %6 = vector.load %arg9[%c0_7, %c0_8] : memref<4x128xf32, #tpu.memory_space<vmem>>, vector<4x128xf32>
    %7 = vector.extract_strided_slice %6 {offsets = [0, 0], sizes = [1, 128], strides = [1, 1]} : vector<4x128xf32> to vector<1x128xf32>
    %8 = vector.extract_strided_slice %6 {offsets = [1, 0], sizes = [1, 128], strides = [1, 1]} : vector<4x128xf32> to vector<1x128xf32>
    %9 = vector.extract_strided_slice %6 {offsets = [2, 0], sizes = [1, 128], strides = [1, 1]} : vector<4x128xf32> to vector<1x128xf32>
    %10 = vector.extract_strided_slice %6 {offsets = [3, 0], sizes = [1, 128], strides = [1, 1]} : vector<4x128xf32> to vector<1x128xf32>
    %c0_9 = arith.constant 0 : index
    %c0_10 = arith.constant 0 : index
    %11 = vector.load %arg4[%c0_9, %c0_10] : memref<32x128xbf16, #tpu.memory_space<vmem>>, vector<32x128xbf16>
    %cst = arith.constant dense<0.000000e+00> : vector<16x128xf32>
    %12 = tpu.matmul %1, %11, %cst {dimension_numbers = #tpu.dot_dimension_numbers<[1], [0], [0], [1], [0, 0, 1, 1], [], []>} : vector<16x32xbf16>, vector<32x128xbf16>, vector<16x128xf32> -> vector<16x128xf32>
    %13 = vector.broadcast %7 : vector<1x128xf32> to vector<16x128xf32>
    %14 = arith.addf %12, %13 : vector<16x128xf32>
    %c0_11 = arith.constant 0 : index
    %c0_12 = arith.constant 0 : index
    %15 = vector.load %arg5[%c0_11, %c0_12] : memref<32x128xbf16, #tpu.memory_space<vmem>>, vector<32x128xbf16>
    %cst_13 = arith.constant dense<0.000000e+00> : vector<16x128xf32>
    %16 = tpu.matmul %3, %15, %cst_13 {dimension_numbers = #tpu.dot_dimension_numbers<[1], [0], [0], [1], [0, 0, 1, 1], [], []>} : vector<16x32xbf16>, vector<32x128xbf16>, vector<16x128xf32> -> vector<16x128xf32>
    %17 = vector.broadcast %8 : vector<1x128xf32> to vector<16x128xf32>
    %18 = arith.addf %16, %17 : vector<16x128xf32>
    %cst_14 = arith.constant 0.000000e+00 : f32
    %19 = vector.broadcast %cst_14 : f32 to vector<16x128xf32>
    %20 = arith.maximumf %14, %19 : vector<16x128xf32>
    %cst_15 = arith.constant 0.000000e+00 : f32
    %21 = vector.broadcast %cst_15 : f32 to vector<16x128xf32>
    %22 = arith.maximumf %18, %21 : vector<16x128xf32>
    %23 = arith.addf %20, %22 : vector<16x128xf32>
    %24 = vector.broadcast %5 : vector<1x128xf32> to vector<16x128xf32>
    %25 = arith.addf %23, %24 : vector<16x128xf32>
    %26 = tpu.iota {dimensions = array<i32: 0>} : vector<16x1xi32>
    %c0_i32 = arith.constant 0 : i32
    %27 = vector.broadcast %c0_i32 : i32 to vector<16x1xi32>
    %28 = arith.cmpi eq, %26, %27 : vector<16x1xi32>
    %c15_i32 = arith.constant 15 : i32
    %29 = vector.broadcast %c15_i32 : i32 to vector<16x1xi32>
    %30 = arith.cmpi eq, %26, %29 : vector<16x1xi32>
    %c1_i32 = arith.constant 1 : i32
    %31 = tpu.dynamic_rotate %25 by %c1_i32 dim 0 : vector<16x128xf32>, i32 -> vector<16x128xf32>
    %cst_16 = arith.constant 0.000000e+00 : f32
    %32 = vector.shape_cast %28 : vector<16x1xi1> to vector<16x1xi1>
    %33 = vector.broadcast %32 : vector<16x1xi1> to vector<16x128xi1>
    %34 = vector.broadcast %cst_16 : f32 to vector<16x128xf32>
    %35 = arith.select %33, %34, %31 : vector<16x128xi1>, vector<16x128xf32>
    %c15_i32_17 = arith.constant 15 : i32
    %36 = tpu.dynamic_rotate %25 by %c15_i32_17 dim 0 : vector<16x128xf32>, i32 -> vector<16x128xf32>
    %cst_18 = arith.constant 0.000000e+00 : f32
    %37 = vector.shape_cast %30 : vector<16x1xi1> to vector<16x1xi1>
    %38 = vector.broadcast %37 : vector<16x1xi1> to vector<16x128xi1>
    %39 = vector.broadcast %cst_18 : f32 to vector<16x128xf32>
    %40 = arith.select %38, %39, %36 : vector<16x128xi1>, vector<16x128xf32>
    %41 = arith.truncf %35 : vector<16x128xf32> to vector<16x128xbf16>
    %c0_19 = arith.constant 0 : index
    %c0_20 = arith.constant 0 : index
    %c0_21 = arith.constant 0 : index
    %42 = vector.load %arg6[%c0_19, %c0_20, %c0_21] : memref<3x128x128xbf16, #tpu.memory_space<vmem>>, vector<1x128x128xbf16>
    %43 = vector.shape_cast %42 : vector<1x128x128xbf16> to vector<128x128xbf16>
    %cst_22 = arith.constant dense<0.000000e+00> : vector<16x128xf32>
    %44 = tpu.matmul %41, %43, %cst_22 {dimension_numbers = #tpu.dot_dimension_numbers<[1], [0], [0], [1], [0, 0, 1, 1], [], []>} : vector<16x128xbf16>, vector<128x128xbf16>, vector<16x128xf32> -> vector<16x128xf32>
    %45 = arith.truncf %25 : vector<16x128xf32> to vector<16x128xbf16>
    %c1 = arith.constant 1 : index
    %c0_23 = arith.constant 0 : index
    %c0_24 = arith.constant 0 : index
    %46 = vector.load %arg6[%c1, %c0_23, %c0_24] : memref<3x128x128xbf16, #tpu.memory_space<vmem>>, vector<1x128x128xbf16>
    %47 = vector.shape_cast %46 : vector<1x128x128xbf16> to vector<128x128xbf16>
    %cst_25 = arith.constant dense<0.000000e+00> : vector<16x128xf32>
    %48 = tpu.matmul %45, %47, %cst_25 {dimension_numbers = #tpu.dot_dimension_numbers<[1], [0], [0], [1], [0, 0, 1, 1], [], []>} : vector<16x128xbf16>, vector<128x128xbf16>, vector<16x128xf32> -> vector<16x128xf32>
    %49 = arith.addf %44, %48 : vector<16x128xf32>
    %50 = arith.truncf %40 : vector<16x128xf32> to vector<16x128xbf16>
    %c2 = arith.constant 2 : index
    %c0_26 = arith.constant 0 : index
    %c0_27 = arith.constant 0 : index
    %51 = vector.load %arg6[%c2, %c0_26, %c0_27] : memref<3x128x128xbf16, #tpu.memory_space<vmem>>, vector<1x128x128xbf16>
    %52 = vector.shape_cast %51 : vector<1x128x128xbf16> to vector<128x128xbf16>
    %cst_28 = arith.constant dense<0.000000e+00> : vector<16x128xf32>
    %53 = tpu.matmul %50, %52, %cst_28 {dimension_numbers = #tpu.dot_dimension_numbers<[1], [0], [0], [1], [0, 0, 1, 1], [], []>} : vector<16x128xbf16>, vector<128x128xbf16>, vector<16x128xf32> -> vector<16x128xf32>
    %54 = arith.addf %49, %53 : vector<16x128xf32>
    %55 = vector.broadcast %9 : vector<1x128xf32> to vector<16x128xf32>
    %56 = arith.addf %54, %55 : vector<16x128xf32>
    %cst_29 = arith.constant 0.000000e+00 : f32
    %57 = vector.broadcast %cst_29 : f32 to vector<16x128xf32>
    %58 = arith.maximumf %56, %57 : vector<16x128xf32>
    %c1_i32_30 = arith.constant 1 : i32
    %59 = tpu.dynamic_rotate %58 by %c1_i32_30 dim 0 : vector<16x128xf32>, i32 -> vector<16x128xf32>
    %cst_31 = arith.constant 0.000000e+00 : f32
    %60 = vector.shape_cast %28 : vector<16x1xi1> to vector<16x1xi1>
    %61 = vector.broadcast %60 : vector<16x1xi1> to vector<16x128xi1>
    %62 = vector.broadcast %cst_31 : f32 to vector<16x128xf32>
    %63 = arith.select %61, %62, %59 : vector<16x128xi1>, vector<16x128xf32>
    %c15_i32_32 = arith.constant 15 : i32
    %64 = tpu.dynamic_rotate %58 by %c15_i32_32 dim 0 : vector<16x128xf32>, i32 -> vector<16x128xf32>
    %cst_33 = arith.constant 0.000000e+00 : f32
    %65 = vector.shape_cast %30 : vector<16x1xi1> to vector<16x1xi1>
    %66 = vector.broadcast %65 : vector<16x1xi1> to vector<16x128xi1>
    %67 = vector.broadcast %cst_33 : f32 to vector<16x128xf32>
    %68 = arith.select %66, %67, %64 : vector<16x128xi1>, vector<16x128xf32>
    %69 = arith.truncf %63 : vector<16x128xf32> to vector<16x128xbf16>
    %c0_34 = arith.constant 0 : index
    %c0_35 = arith.constant 0 : index
    %c0_36 = arith.constant 0 : index
    %70 = vector.load %arg7[%c0_34, %c0_35, %c0_36] : memref<3x128x128xbf16, #tpu.memory_space<vmem>>, vector<1x128x128xbf16>
    %71 = vector.shape_cast %70 : vector<1x128x128xbf16> to vector<128x128xbf16>
    %cst_37 = arith.constant dense<0.000000e+00> : vector<16x128xf32>
    %72 = tpu.matmul %69, %71, %cst_37 {dimension_numbers = #tpu.dot_dimension_numbers<[1], [0], [0], [1], [0, 0, 1, 1], [], []>} : vector<16x128xbf16>, vector<128x128xbf16>, vector<16x128xf32> -> vector<16x128xf32>
    %73 = arith.truncf %58 : vector<16x128xf32> to vector<16x128xbf16>
    %c1_38 = arith.constant 1 : index
    %c0_39 = arith.constant 0 : index
    %c0_40 = arith.constant 0 : index
    %74 = vector.load %arg7[%c1_38, %c0_39, %c0_40] : memref<3x128x128xbf16, #tpu.memory_space<vmem>>, vector<1x128x128xbf16>
    %75 = vector.shape_cast %74 : vector<1x128x128xbf16> to vector<128x128xbf16>
    %cst_41 = arith.constant dense<0.000000e+00> : vector<16x128xf32>
    %76 = tpu.matmul %73, %75, %cst_41 {dimension_numbers = #tpu.dot_dimension_numbers<[1], [0], [0], [1], [0, 0, 1, 1], [], []>} : vector<16x128xbf16>, vector<128x128xbf16>, vector<16x128xf32> -> vector<16x128xf32>
    %77 = arith.addf %72, %76 : vector<16x128xf32>
    %78 = arith.truncf %68 : vector<16x128xf32> to vector<16x128xbf16>
    %c2_42 = arith.constant 2 : index
    %c0_43 = arith.constant 0 : index
    %c0_44 = arith.constant 0 : index
    %79 = vector.load %arg7[%c2_42, %c0_43, %c0_44] : memref<3x128x128xbf16, #tpu.memory_space<vmem>>, vector<1x128x128xbf16>
    %80 = vector.shape_cast %79 : vector<1x128x128xbf16> to vector<128x128xbf16>
    %cst_45 = arith.constant dense<0.000000e+00> : vector<16x128xf32>
    %81 = tpu.matmul %78, %80, %cst_45 {dimension_numbers = #tpu.dot_dimension_numbers<[1], [0], [0], [1], [0, 0, 1, 1], [], []>} : vector<16x128xbf16>, vector<128x128xbf16>, vector<16x128xf32> -> vector<16x128xf32>
    %82 = arith.addf %77, %81 : vector<16x128xf32>
    %83 = vector.broadcast %10 : vector<1x128xf32> to vector<16x128xf32>
    %84 = arith.addf %82, %83 : vector<16x128xf32>
    %cst_46 = arith.constant 0.000000e+00 : f32
    %85 = vector.broadcast %cst_46 : f32 to vector<16x128xf32>
    %86 = arith.maximumf %84, %85 : vector<16x128xf32>
    %87 = arith.truncf %86 : vector<16x128xf32> to vector<16x128xbf16>
    %c0_47 = arith.constant 0 : index
    %c0_48 = arith.constant 0 : index
    %88 = vector.load %arg8[%c0_47, %c0_48] : memref<128x128xbf16, #tpu.memory_space<vmem>>, vector<128x128xbf16>
    %cst_49 = arith.constant dense<0.000000e+00> : vector<16x128xf32>
    %89 = tpu.matmul %87, %88, %cst_49 {dimension_numbers = #tpu.dot_dimension_numbers<[1], [0], [0], [1], [0, 0, 1, 1], [], []>} : vector<16x128xbf16>, vector<128x128xbf16>, vector<16x128xf32> -> vector<16x128xf32>
    %c0_50 = arith.constant 0 : index
    %c0_51 = arith.constant 0 : index
    %90 = vector.load %arg10[%c0_50, %c0_51] : memref<1x128xf32, #tpu.memory_space<vmem>>, vector<1x128xf32>
    %91 = vector.broadcast %90 : vector<1x128xf32> to vector<16x128xf32>
    %92 = arith.addf %89, %91 : vector<16x128xf32>
    %c0_52 = arith.constant 0 : index
    %c0_53 = arith.constant 0 : index
    %c0_54 = arith.constant 0 : index
    %93 = vector.load %arg11[%c0_52, %c0_53, %c0_54] : memref<1x16x128xf32, #tpu.memory_space<vmem>>, vector<1x16x128xf32>
    %94 = vector.shape_cast %93 : vector<1x16x128xf32> to vector<16x128xf32>
    %95 = vector.shape_cast %92 : vector<16x128xf32> to vector<1x16x128xf32>
    tpu.vector_store %arg11[%c0_52, %c0_53, %c0_54], %95 {strides = array<i32>} : memref<1x16x128xf32, #tpu.memory_space<vmem>>, vector<1x16x128xf32>,
    return
  }
  func.func @transform_0(%arg0: i32) -> (i32, i32, i32) {
    %c0_i32 = arith.constant 0 : i32
    %c0_i32_0 = arith.constant 0 : i32
    %c0_i32_1 = arith.constant 0 : i32
    return %arg0, %c0_i32, %c0_i32_0 : i32, i32, i32
  }
  func.func @transform_1(%arg0: i32) -> (i32, i32, i32) {
    %c0_i32 = arith.constant 0 : i32
    %c0_i32_0 = arith.constant 0 : i32
    %c0_i32_1 = arith.constant 0 : i32
    return %arg0, %c0_i32, %c0_i32_0 : i32, i32, i32
  }
  func.func @transform_2(%arg0: i32) -> (i32, i32) {
    %c0_i32 = arith.constant 0 : i32
    %c0_i32_0 = arith.constant 0 : i32
    return %arg0, %c0_i32 : i32, i32
  }
  func.func @transform_3(%arg0: i32) -> (i32, i32) {
    %c0_i32 = arith.constant 0 : i32
    %c0_i32_0 = arith.constant 0 : i32
    %c0_i32_1 = arith.constant 0 : i32
    return %c0_i32, %c0_i32_0 : i32, i32
  }
  func.func @transform_4(%arg0: i32) -> (i32, i32) {
    %c0_i32 = arith.constant 0 : i32
    %c0_i32_0 = arith.constant 0 : i32
    %c0_i32_1 = arith.constant 0 : i32
    return %c0_i32, %c0_i32_0 : i32, i32
  }
  func.func @transform_5(%arg0: i32) -> (i32, i32, i32) {
    %c0_i32 = arith.constant 0 : i32
    %c0_i32_0 = arith.constant 0 : i32
    %c0_i32_1 = arith.constant 0 : i32
    %c0_i32_2 = arith.constant 0 : i32
    return %c0_i32, %c0_i32_0, %c0_i32_1 : i32, i32, i32
  }
  func.func @transform_6(%arg0: i32) -> (i32, i32, i32) {
    %c0_i32 = arith.constant 0 : i32
    %c0_i32_0 = arith.constant 0 : i32
    %c0_i32_1 = arith.constant 0 : i32
    %c0_i32_2 = arith.constant 0 : i32
    return %c0_i32, %c0_i32_0, %c0_i32_1 : i32, i32, i32
  }
  func.func @transform_7(%arg0: i32) -> (i32, i32) {
    %c0_i32 = arith.constant 0 : i32
    %c0_i32_0 = arith.constant 0 : i32
    %c0_i32_1 = arith.constant 0 : i32
    return %c0_i32, %c0_i32_0 : i32, i32
  }
  func.func @transform_8(%arg0: i32) -> (i32, i32) {
    %c0_i32 = arith.constant 0 : i32
    %c0_i32_0 = arith.constant 0 : i32
    %c0_i32_1 = arith.constant 0 : i32
    return %c0_i32, %c0_i32_0 : i32, i32
  }
  func.func @transform_9(%arg0: i32) -> (i32, i32) {
    %c0_i32 = arith.constant 0 : i32
    %c0_i32_0 = arith.constant 0 : i32
    %c0_i32_1 = arith.constant 0 : i32
    return %c0_i32, %c0_i32_0 : i32, i32
  }
  func.func @transform_10(%arg0: i32) -> (i32, i32, i32) {
    %c0_i32 = arith.constant 0 : i32
    %c0_i32_0 = arith.constant 0 : i32
    %c0_i32_1 = arith.constant 0 : i32
    return %arg0, %c0_i32, %c0_i32_0 : i32, i32, i32
  }
}

</mosaic_0001>

<bundles_post_ra>
// kernel: tpu_custom_call.1
= control target key start
LH: loop header
LB: loop body
LE: loop exit
PB: predicated region body
PF: predicated region fallthrough
CT: control target
= control target key end

     0   :  { %s3028_s0 = inlined_call_operand.hbm [shape: bf16[2,16,32], index: 0, kind: input, shape index: {}]   ;;  %s3029_s1 = inlined_call_operand.hbm [shape: bf16[2,16,32], index: 1, kind: input, shape index: {}]   ;;  %s3030_s2 = inlined_call_operand.hbm [shape: f32[16,128], index: 2, kind: input, shape index: {}]   ;;  %s3031_s3 = inlined_call_operand.hbm [shape: bf16[32,128], index: 3, kind: input, shape index: {}]   ;;  %s3032_s4 = inlined_call_operand.hbm [shape: bf16[32,128], index: 4, kind: input, shape index: {}]   ;;  %s3033_s5 = inlined_call_operand.hbm [shape: bf16[3,128,128], index: 5, kind: input, shape index: {}]   ;;  %s3034_s6 = inlined_call_operand.hbm [shape: bf16[3,128,128], index: 6, kind: input, shape index: {}]   ;;  %s3035_s7 = inlined_call_operand.hbm [shape: bf16[128,128], index: 7, kind: input, shape index: {}]   ;;  %s3036_s8 = inlined_call_operand.vmem [shape: f32[4,128], index: 8, kind: input, shape index: {}]   ;;  %s3037_s9 = inlined_call_operand.vmem [shape: f32[1,128], index: 9, kind: input, shape index: {}]   ;;  %s3038_s10 = inlined_call_operand.hbm [shape: f32[2,16,128], index: 10, kind: output, shape index: {}]  }
   0x1   :  { %3060 = sst [smem:[#allocation29_spill]] %s3029_s1 }
   0x2   :  { %3061 = sst [smem:[#allocation30_spill]] %s3031_s3 }
   0x3   :  { %3062 = sst [smem:[#allocation31_spill]] %s3032_s4 }
   0x4   :  { %3063 = sst [smem:[#allocation32_spill]] %s3033_s5 }
   0x5   :  { %3064 = sst [smem:[#allocation33_spill]] %s3038_s10 }
   0x6   :  { %15 = vsyncpa [#allocation3], 0 }
   0x7   :  { %17 = vsyncpa [#allocation3 + $0x1], 0 }
   0x8   :  { %18 = vsyncpa [#allocation6], 0 }
   0x9   :  { %20 = vsyncpa [#allocation6 + $0x1], 0 }
   0xa   :  { %21 = vsyncpa [#allocation9], 0 }
   0xb   :  { %22 = vsyncpa [#allocation12], 0 }
   0xc   :  { %23 = vsyncpa [#allocation15], 0 }
   0xd   :  { %24 = vsyncpa [#allocation4], 0 }
   0xe   :  { %26 = vsyncpa [#allocation4 + $0x1], 0  ;;  %s2562_s13 = smov 0   ;;  %s2564_s14 = smov 0  }
   0xf   :  { %s2566_s15 = smov 0   ;;  %s2568_s16 = smov 0  }
  0x10 LB: > { %3065 = sst [smem:[#allocation23_spill]] %s2477_s13  ;;  %s2491_s17 = smov [#allocation8]   ;;  %s2489_s16 = sphi %s2568_s16, %s3108_s16   ;;  %s2485_s15 = sphi %s2566_s15, %s3112_s15   ;;  %s2481_s14 = sphi %s2564_s14, %s3111_s14   ;;  %s2477_s13 = sphi %s2562_s13, %s3110_s13  }
  0x11   : > { %3066 = sst [smem:[#allocation24_spill]] %s2489_s16  ;;  %s300_s18 = sshll.u32 %s2491_s17, 4  ;;  %s301_s18 = int_to_ptr.vmem [resolvable:$true] %s300_s18 }
  0x12   : > { %s2583_s19 = sadd.s32 4294967295, %s2489_s16   ;;  %p1678_p0 = scmp.ge.s32.totalorder %s2489_s16, 1 }
  0x13   : > { %p3051_p1 = scmp.eq.s32.totalorder %s2583_s19, 0  ;;  %p275_p2 = scmp.eq.s32.totalorder %s2583_s19, 1 }
  0x14   : > { %p288_p3 = scmp.lt.s32.totalorder %s2489_s16, 3  ;;  %s2492_s21 = smov [#allocation11]  }
  0x15   : > { %s326_s22 = sshll.u32 %s2492_s21, 4  ;;  %s2206_s25 = scalar_lea.vmem %s301_s18, 256  ;;  %s327_s22 = int_to_ptr.vmem [resolvable:$true] %s326_s22 }
  0x16   : > { %p2589_p4 = pnand %p1678_p0, %p288_p3  ;;  %p2207_p9 = scmp.ne.s32.totalorder %s301_s18, %s2206_s25 }
  0x17   : > { %p2214_p12 = scmp.lt.s32.totalorder %s301_s18, %s301_s18  ;;  %p2215_p13 = scmp.lt.s32.totalorder %s2206_s25, %s2206_s25 }
  0x18   : > { %s3067_s20 = scalar_select %p2589_p4, 1, 0 }
  0x19   : > { %p2047_p6 = pneg %p2589_p4  ;;  %p2216_p0 = por %p2215_p13, %p2214_p12 }
  0x1b   : > { %p2598_p7 = pnand %p2047_p6, %p3051_p1 }
  0x1d   : > { %s3068_s23 = scalar_select %p2598_p7, 1, 0 }
  0x1e   : > { %p2604_p8 = pneg %p2598_p7 }
  0x20   : > { %s3069_s24 = scalar_select %p2604_p8, 1, 0 }
  0x21   : > { %p2209_p10 = pnand %p2207_p9, %p2604_p8 }
  0x23   : > { %p2210_p11 = pneg %p2209_p10 }
  0x25   : > { %p2217_p3 = pnand %p2216_p0, %p2210_p11 }
  0x27   : > { %2220 = shalt.err (!%p2217_p3)
}
  0x28   : > { %s3040_s26 = smov 64   ;;  %s3042_s27 = smov 4  }
  0x29   : > { %s3070_s3 = sld [smem:[#allocation30_spill]]  ;;  %s2232_s30 = scalar_lea.vmem %s327_s22, 3072 }
  0x2a   : > { %p2233_p6 = scmp.ne.s32.totalorder %s327_s22, %s2232_s30  ;;  %p2240_p12 = scmp.lt.s32.totalorder %s327_s22, %s327_s22 }
  0x2b   : > { %p2241_p11 = scmp.lt.s32.totalorder %s2232_s30, %s2232_s30 }
  0x2c   : > { %p2235_p9 = pnand %p2233_p6, %p2604_p8 }
  0x2d   : > { %p2242_p13 = por %p2241_p11, %p2240_p12 }
  0x2e   : > { %p2236_p10 = pneg %p2235_p9 }
  0x2f   : > { %2050 = dma.hbm_to_vmem [thread:$0]  (!%p2598_p7), %s3070_s3, 256, %s301_s18, [#allocation9], %s3040_s26, %s3040_s26, %s3042_s27  }
  0x30   : > { %p2243_p0 = pnand %p2242_p13, %p2236_p10 }
  0x32   : > { %2246 = shalt.err (!%p2243_p0)
}
  0x33   : > { %s3071_s5 = sld [smem:[#allocation32_spill]]  ;;  %s1677_s17 = sadd.s32 4294967294, %s2489_s16  }
  0x34   : > { %s2630_s18 = sadd.s32 1, %s2489_s16   ;;  %s39_s21 = sadd.s32 1, %s2485_s15 }
  0x35   : > { %3072 = sst [smem:[#allocation25_spill]] %s2630_s18  ;;  %s36_s25 = ssub.s32 %s2489_s16, %s2630_s18 }
  0x36   : > { %p46_p3 = scmp.ne.s32.totalorder %s2485_s15, %s2481_s14  ;;  %p37_p6 = scmp.eq.s32.totalorder %s36_s25, 0 }
  0x37   : > { %p47_p9 = scmp.eq.s32.totalorder %s2489_s16, 0  ;;  %p52_p10 = scmp.ne.s32.totalorder %s2481_s14, %s2477_s13 }
  0x38   : > { %p2642_p12 = por %p275_p2, %p46_p3  ;;  %p281_p0 = scmp.eq.s32.totalorder %s1677_s17, 1 }
  0x39   : > { %2056 = dma.hbm_to_vmem [thread:$0]  (!%p2598_p7), %s3071_s5, 3072, %s327_s22, [#allocation12], %s3040_s26, %s3040_s26, %s3042_s27  }
  0x3a   : > { %s3073_s28 = scalar_select %p2642_p12, 1, 0 }
  0x3b   : > { %s2647_s29 = scalar_select %p37_p6, %s2485_s15, %s39_s21  }
  0x3c   : > { %3074 = sst [smem:[#allocation26_spill]] %s3073_s28  ;;  %p48_p11 = por %p47_p9, %p46_p3 }
  0x3d   : > { %3075 = sst [smem:[#allocation27_spill]] %s2647_s29  ;;  %p2651_p13 = por %p3051_p1, %p52_p10 }
  0x3e   : > { %p2082_p5 = scmp.lt.s32.totalorder %s2489_s16, 2  ;;  %s3044_s30 = sand.u32 1, %s2485_s15  }
  0x3f   : > { %s3076_s22 = scalar_select %p2651_p13, 1, 0 }
  0x40   : > { %s2658_s11 = sshll.u32 %s2489_s16, 7  ;;  %p2660_p4 = por %p281_p0, %p52_p10 }
  0x41   : > { %s2666_s25 = sshll.u32 %s3044_s30, 3  ;;  %p2668_p2 = pnand %p2082_p5, %p48_p11 }
  0x42   : > { %s3077_s12 = scalar_select %p2660_p4, 1, 0 }
  0x43   : > { %s393_s26 = sand.u32 1, %s2489_s16   ;;  %s3080_s1 = sld [smem:[#allocation29_spill]] }
  0x44   : > { %3078 = sst [smem:[#allocation28_spill]] %s3077_s12  ;;  %s397_s5 = scalar_lea.vmem [#allocation5], %s2666_s25 }
  0x45   : > { %s404_s29 = sshll.u32 %s397_s5, 4  ;;  %s2495_s30 = smov [#allocation10]   ;;  %s2680_s29 = int_to_ptr.vmem [resolvable:$true] %s404_s29 }
  0x46   : > { %s2682_s18 = sshll.u32 %s2495_s30, 4  ;;  %s2684_s12 = scalar_lea.sflag [#allocation6], %s393_s26  ;;  %s314_s18 = int_to_ptr.vmem [resolvable:$true] %s2682_s18 }
  0x47   : > { %p2690_p3 = pneg %p2668_p2 }
  0x49   : > { %s2677_s3 = scalar_lea.hbm %s3080_s1, %s2658_s11  ;;  %s2252_s17 = scalar_lea.hbm %s3080_s1, 256 }
  0x4a   : > { %s2247_s13 = scalar_lea.hbm %s2677_s3, 128  ;;  %p2253_p10 = scmp.lt.s32.totalorder %s2677_s3, %s3080_s1 }
  0x4b   : > { %p2248_p5 = scmp.ne.s32.totalorder %s2677_s3, %s2247_s13  ;;  %p2254_p11 = scmp.lt.s32.totalorder %s2252_s17, %s2247_s13 }
  0x4d   : > { %p2250_p6 = pnand %p2690_p3, %p2248_p5  ;;  %p2255_p0 = por %p2254_p11, %p2253_p10 }
  0x4f   : > { %p2251_p9 = pneg %p2250_p6 }
  0x51   : > { %p2256_p1 = pnand %p2255_p0, %p2251_p9 }
  0x53   : > { %2259 = shalt.err (!%p2256_p1)
}
  0x54   : > { %s2260_s26 = scalar_lea.vmem %s2680_s29, 128  ;;  %s2496_s28 = smov [#allocation5]  }
  0x55   : > { %p2261_p4 = scmp.ne.s32.totalorder %s2680_s29, %s2260_s26  ;;  %s2265_s27 = sshll.u32 %s2496_s28, 4  ;;  %s2266_s27 = int_to_ptr.vmem [resolvable:$false] %s2265_s27 }
  0x56   : > { %s2267_s5 = scalar_lea.vmem %s2266_s27, 256  ;;  %p2268_p12 = scmp.lt.s32.totalorder %s2680_s29, %s2266_s27 }
  0x57   : > { %p2263_p5 = pnand %p2261_p4, %p2690_p3  ;;  %p2269_p13 = scmp.lt.s32.totalorder %s2267_s5, %s2260_s26 }
  0x59   : > { %p2264_p6 = pneg %p2263_p5  ;;  %p2270_p7 = por %p2269_p13, %p2268_p12 }
  0x5b   : > { %p2271_p8 = pnand %p2270_p7, %p2264_p6 }
  0x5d   : > { %2274 = shalt.err (!%p2271_p8)
}
  0x5e   : > { %s3082_s10 = smov 4   ;;  %s3083_s13 = smov 64  }
  0x5f   : > { %2069 = dma.hbm_to_vmem [thread:$0]  (!%p2668_p2), %s2677_s3, 128, %s2680_s29, %s2684_s12, %s3083_s13, %s3083_s13, %s3082_s10  }
  0x60   : > { %s2286_s28 = scalar_lea.vmem %s314_s18, 256  ;;  %p3084_p4 = scmp.ne.s32.totalorder %s3069_s24, 0 }
  0x61   : > { %p2287_p1 = scmp.ne.s32.totalorder %s314_s18, %s2286_s28  ;;  %p2294_p12 = scmp.lt.s32.totalorder %s314_s18, %s314_s18 }
  0x62   : > { %p2295_p7 = scmp.lt.s32.totalorder %s2286_s28, %s2286_s28 }
  0x63   : > { %p2289_p9 = pnand %p2287_p1, %p3084_p4 }
  0x64   : > { %p2296_p8 = por %p2295_p7, %p2294_p12 }
  0x65   : > { %p2290_p10 = pneg %p2289_p9 }
  0x67   : > { %p2297_p13 = pnand %p2296_p8, %p2290_p10 }
  0x69   : > { %2300 = shalt.err (!%p2297_p13)
}
  0x6a   : > { %p3085_p11 = scmp.ne.s32.totalorder %s3068_s23, 0  ;;  %s3086_s4 = sld [smem:[#allocation31_spill]] }
  0x6b   : > { %s2497_s3 = smov [#allocation13]   ;;  %s2498_s26 = smov [#allocation14]  }
  0x6c   : > { %s339_s29 = sshll.u32 %s2497_s3, 4  ;;  %s352_s27 = sshll.u32 %s2498_s26, 4  ;;  %s340_s29 = int_to_ptr.vmem [resolvable:$true] %s339_s29  ;;  %s353_s27 = int_to_ptr.vmem [resolvable:$true] %s352_s27 }
  0x6d   : > { %s2312_s5 = scalar_lea.vmem %s340_s29, 3072  ;;  %p2320_p1 = scmp.lt.s32.totalorder %s340_s29, %s340_s29 }
  0x6e   : > { %p2313_p0 = scmp.ne.s32.totalorder %s340_s29, %s2312_s5  ;;  %p2321_p9 = scmp.lt.s32.totalorder %s2312_s5, %s2312_s5 }
  0x70   : > { %2053 = dma.hbm_to_vmem [thread:$0]  (!%p3085_p11), %s3086_s4, 256, %s314_s18, [#allocation9], %s3083_s13, %s3083_s13, %s3082_s10  }
  0x71   : > { %p2315_p5 = pnand %p2313_p0, %p3084_p4  ;;  %p2322_p10 = por %p2321_p9, %p2320_p1 }
  0x73   : > { %p2316_p6 = pneg %p2315_p5 }
  0x75   : > { %p2323_p12 = pnand %p2322_p10, %p2316_p6 }
  0x77   : > { %2326 = shalt.err (!%p2323_p12)
}
  0x78   : > { %2059 = dma.hbm_to_vmem [thread:$0]  (!%p3085_p11), %s3034_s6, 3072, %s340_s29, [#allocation12], %s3083_s13, %s3083_s13, %s3082_s10  }
  0x79   : > { %s2338_s17 = scalar_lea.vmem %s353_s27, 1024  ;;  %p2346_p0 = scmp.lt.s32.totalorder %s353_s27, %s353_s27 }
  0x7a   : > { %p2339_p7 = scmp.ne.s32.totalorder %s353_s27, %s2338_s17  ;;  %p2347_p5 = scmp.lt.s32.totalorder %s2338_s17, %s2338_s17 }
  0x7c   : > { %p2341_p8 = pnand %p2339_p7, %p3084_p4  ;;  %p2348_p6 = por %p2347_p5, %p2346_p0 }
  0x7e   : > { %p2342_p13 = pneg %p2341_p8 }
  0x80   : > { %p2349_p1 = pnand %p2348_p6, %p2342_p13 }
  0x82   : > { %2352 = shalt.err (!%p2349_p1)
}
  0x83   : > { %2062 = dma.hbm_to_vmem [thread:$0]  (!%p3085_p11), %s3035_s7, 1024, %s353_s27, [#allocation15], %s3083_s13, %s3083_s13, %s3082_s10  }
  0x84   : > { %s2751_s26 = scalar_lea.hbm %s3028_s0, %s2658_s11  ;;  %s376_s23 = scalar_lea.vmem [#allocation2], %s2666_s25 }
  0x85   : > { %s383_s5 = sshll.u32 %s376_s23, 4  ;;  %s2760_s17 = scalar_lea.hbm %s3030_s2, %s2658_s11  ;;  %s2754_s5 = int_to_ptr.vmem [resolvable:$true] %s383_s5 }
  0x86   : > { %s3087_s30 = sand.u32 1, %s2485_s15   ;;  %s2353_s27 = scalar_lea.hbm %s2751_s26, 128 }
  0x87   : > { %s373_s3 = scalar_lea.sflag [#allocation3], %s3087_s30  ;;  %p2354_p4 = scmp.ne.s32.totalorder %s2751_s26, %s2353_s27 }
  0x88   : > { %s2358_s1 = scalar_lea.hbm %s3028_s0, 256  ;;  %p2359_p10 = scmp.lt.s32.totalorder %s2751_s26, %s3028_s0 }
  0x89   : > { %p2356_p11 = pnand %p2354_p4, %p2690_p3  ;;  %p2360_p12 = scmp.lt.s32.totalorder %s2358_s1, %s2353_s27 }
  0x8b   : > { %p2357_p9 = pneg %p2356_p11  ;;  %p2361_p7 = por %p2360_p12, %p2359_p10 }
  0x8d   : > { %p2362_p8 = pnand %p2361_p7, %p2357_p9 }
  0x8f   : > { %2365 = shalt.err (!%p2362_p8)
}
  0x90   : > { %s2366_s11 = scalar_lea.vmem %s2754_s5, 128  ;;  %s2499_s18 = smov [#allocation2]  }
  0x91   : > { %p2367_p13 = scmp.ne.s32.totalorder %s2754_s5, %s2366_s11  ;;  %s2371_s28 = sshll.u32 %s2499_s18, 4  ;;  %s2372_s28 = int_to_ptr.vmem [resolvable:$false] %s2371_s28 }
  0x92   : > { %s2373_s30 = scalar_lea.vmem %s2372_s28, 256  ;;  %p2374_p6 = scmp.lt.s32.totalorder %s2754_s5, %s2372_s28 }
  0x93   : > { %p2369_p0 = pnand %p2367_p13, %p2690_p3  ;;  %p2375_p1 = scmp.lt.s32.totalorder %s2373_s30, %s2366_s11 }
  0x95   : > { %p2370_p5 = pneg %p2369_p0  ;;  %p2376_p4 = por %p2375_p1, %p2374_p6 }
  0x97   : > { %p2377_p11 = pnand %p2376_p4, %p2370_p5 }
  0x99   : > { %2380 = shalt.err (!%p2377_p11)
}
  0x9a   : > { %2066 = dma.hbm_to_vmem [thread:$0]  (!%p2668_p2), %s2751_s26, 128, %s2754_s5, %s373_s3, %s3083_s13, %s3083_s13, %s3082_s10  }
  0x9b   : > { %s418_s1 = scalar_lea.vmem [#allocation7], %s2666_s25  ;;  %s2381_s27 = scalar_lea.hbm %s2760_s17, 128 }
  0x9c   : > { %s425_s4 = sshll.u32 %s418_s1, 4  ;;  %p2382_p9 = scmp.ne.s32.totalorder %s2760_s17, %s2381_s27  ;;  %s426_s4 = int_to_ptr.vmem [resolvable:$true] %s425_s4 }
  0x9d   : > { %s2386_s23 = scalar_lea.hbm %s3030_s2, 256  ;;  %p2387_p7 = scmp.lt.s32.totalorder %s2760_s17, %s3030_s2 }
  0x9e   : > { %p2384_p10 = pnand %p2382_p9, %p2690_p3  ;;  %p2388_p8 = scmp.lt.s32.totalorder %s2386_s23, %s2381_s27 }
  0xa0   : > { %p2385_p12 = pneg %p2384_p10  ;;  %p2389_p13 = por %p2388_p8, %p2387_p7 }
  0xa2   : > { %p2390_p0 = pnand %p2389_p13, %p2385_p12 }
  0xa4   : > { %2393 = shalt.err (!%p2390_p0)
}
  0xa5   : > { %s2394_s25 = scalar_lea.vmem %s426_s4, 128  ;;  %s2500_s10 = smov [#allocation7]  }
  0xa6   : > { %p2395_p5 = scmp.ne.s32.totalorder %s426_s4, %s2394_s25  ;;  %s2399_s13 = sshll.u32 %s2500_s10, 4  ;;  %s2400_s13 = int_to_ptr.vmem [resolvable:$false] %s2399_s13 }
  0xa7   : > { %s2401_s26 = scalar_lea.vmem %s2400_s13, 256  ;;  %p2402_p4 = scmp.lt.s32.totalorder %s426_s4, %s2400_s13 }
  0xa8   : > { %p2397_p6 = pnand %p2395_p5, %p2690_p3  ;;  %p2403_p11 = scmp.lt.s32.totalorder %s2401_s26, %s2394_s25 }
  0xaa   : > { %p2398_p1 = pneg %p2397_p6  ;;  %p2404_p9 = por %p2403_p11, %p2402_p4 }
  0xac   : > { %p2405_p10 = pnand %p2404_p9, %p2398_p1 }
  0xae   : > { %2408 = shalt.err (!%p2405_p10)
}
  0xaf   : > { %2072 = dma.hbm_to_vmem [thread:$0]  (!%p2668_p2), %s2760_s17, 128, %s426_s4, %s2684_s12  }
  0xb0   : > { %p3088_p12 = scmp.ne.s32.totalorder %s3067_s20, 0 }
  0xb1   : > { %s2808_s16 = sand.u32 (!%p3088_p12), 1, %s2481_s14   ;;  %p3089_p3 = scmp.ne.s32.totalorder (!%p3088_p12), %s3076_s22, 0 }
  0xb2   : > { %434 = sbr.rel (%p3088_p12) target bundleno = 1108 (0x454), region = 60  ;;  %s2811_s5 = sshll.u32 (!%p3088_p12), %s2808_s16, 3 }
  0xb3   : > { %s437_s3 = scalar_lea.sflag (!%p3088_p12), [#allocation3], %s2808_s16  ;;  %s440_s28 = scalar_lea.vmem (!%p3088_p12), [#allocation2], %s2811_s5 }
  0xb7   : > { %2452 = dma.done.wait (%p3089_p3), %s437_s3, 128  }
  0xb8   : > { %2454 = vsyncadd (%p3089_p3), %s437_s3, 4294967168  ;;  %s445_s20 = sand.u32 1, %s2583_s19   ;;  %s449_s21 = scalar_lea.vmem [#allocation5], %s2811_s5 }
  0xb9   : > { %s446_s12 = scalar_lea.sflag [#allocation6], %s445_s20 }
  0xba   : > { %2456 = dma.done.wait (%p3089_p3), %s446_s12, 256  }
  0xbb   : > { %2458 = vsyncadd (%p3089_p3), %s446_s12, 4294967040  ;;  %s458_s17 = scalar_lea.vmem [#allocation7], %s2811_s5  ;;  %p3090_p2 = scmp.eq.s32.totalorder %s2583_s19, 0 }
  0xbd   : > { %2460 = dma.done.wait (%p3090_p2), [#allocation9], 512   ;;  %p3091_p7 = pmov %p3090_p2 }
  0xbe   : > { %p3092_p8 = pmov %p3090_p2 }
  0xbf   : > { %2462 = vsyncadd (%p3091_p7), [#allocation9], 4294966784 }
  0xc0   : > { %2464 = dma.done.wait (%p3092_p8), [#allocation12], 6144   ;;  %p3093_p13 = pmov %p3090_p2 }
  0xc1   : > { %p3094_p0 = pmov %p3090_p2 }
  0xc2   : > { %2466 = vsyncadd (%p3093_p13), [#allocation12], 4294961152 }
  0xc3   : > { %2468 = dma.done.wait (%p3094_p0), [#allocation15], 1024   ;;  %p3095_p5 = pmov %p3094_p0 }
  0xc4   : > { %v2501_v0 = vmov 0.0   ;;  %vm2502_vm0 = vmmov 0   ;;  %v2133_v1 = vld [vmem:[#allocation8 + $0x8] sm:$0xff]   ;;  %v2134_v2 = vld [vmem:[#allocation8] sm:$0xff]   ;;  %v2135_v3 = vld [vmem:[%s440_s28] sm:$0xff]   ;;  %vm557_vm1 = vcmask 261120   ;;  %v536_v23 = vlaneseq }
  0xc5   : > { %2470 = vsyncadd (%p3095_p5), [#allocation15], 4294966272  ;;  %1863 = vmatprep.subr.bf16.mxu1 %v2501_v0  ;;  %1867 = vmatprep.mubr.msk.bf16.mxu1 %vm2502_vm0, %v2501_v0  ;;  %v2136_v4 = vld [vmem:[#allocation10 + $0x8] sm:$0xff]   ;;  %v2140_v6 = vld [vmem:[#allocation11 + $0x70] sm:$0xff]   ;;  %vm2503_vm4 = vmmov 1   ;;  %s1702_s1 = sshll.u32 %s2808_s16, 4 }
  0xc6   : > { %1879 = vmatprep.subr.bf16.mxu0 %v2501_v0  ;;  %1895 = vmatprep.mubr.msk.bf16.mxu0 %vm2502_vm0, %v2501_v0  ;;  %v2139_v5 = vld [vmem:[#allocation11 + $0x78] sm:$0xff]   ;;  %v2137_v7 = vld [vmem:[#allocation10] sm:$0xff]   ;;  %v2138_v8 = vld [vmem:[%s449_s21] sm:$0xff]   ;;  %v2872_v24 = vshrl.u32 %v536_v23, 7  ;;  %s3100_s24 = sld [smem:[#allocation26_spill]]  ;;  %s524_s29 = scalar_lea.vmem [#allocation16], %s1702_s1 }
  0xc7   : > { %1864 = vmatpush3.bf16.msra.mxu1 %v2133_v1  ;;  %1880 = vmatpush3.bf16.msra.mxu0 %v2139_v5  ;;  %v2142_v9 = vld [vmem:[#allocation11 + $0x68] sm:$0xff]   ;;  %v2141_v10 = vld [vmem:[#allocation11 + $0x38] sm:$0xff]   ;;  %v2143_v11 = vld [vmem:[#allocation11 + $0x30] sm:$0xff]   ;;  %s1513_s23 = sshll.u32 %s524_s29, 4  ;;  %s1791_s11 = sshll.u32 %s2583_s19, 8  ;;  %s2980_s23 = int_to_ptr.vmem [resolvable:$true] %s1513_s23 }
  0xc8   : > { %1865 = vmatprep.subr.bf16.mxu1 %v2501_v0  ;;  %1881 = vmatprep.subr.bf16.mxu0 %v2501_v0  ;;  %v2144_v12 = vld [vmem:[#allocation11 + $0x60] sm:$0xff]   ;;  %v2145_v13 = vld [vmem:[#allocation11 + $0x28] sm:$0xff]   ;;  %v2146_v14 = vld [vmem:[#allocation11 + $0x58] sm:$0xff]   ;;  %v538_v25 = vsub.s32 0, %v2872_v24  ;;  %v608_v28 = vsub.s32 1, %v2872_v24  ;;  %vm692_vm2 = vcmp.lt.s32.totalorder %v2872_v24, 1 }
  0xc9   : > { %v2147_v15 = vld [vmem:[#allocation11 + $0x20] sm:$0xff]   ;;  %v2148_v16 = vld [vmem:[#allocation11 + $0x50] sm:$0xff]   ;;  %v2149_v17 = vld [vmem:[#allocation11 + $0x18] sm:$0xff]   ;;  %vm1792_vm3 = vcmp.ne.s32.totalorder %v2872_v24, 0  ;;  %vm703_vm6 = vcmp.lt.s32.totalorder %v2872_v24, 7  ;;  %s3101_s10 = sld [smem:[#allocation33_spill]] }
  0xca   : > { %v2150_v18 = vld [vmem:[#allocation11 + $0x48] sm:$0xff]   ;;  %v2151_v19 = vld [vmem:[#allocation11 + $0x10] sm:$0xff]   ;;  %v2152_v20 = vld [vmem:[#allocation11 + $0x40] sm:$0xff]   ;;  %s1500_s26 = scalar_lea.sflag [#allocation4], %s2808_s16  ;;  %s2409_s5 = scalar_lea.vmem %s2980_s23, 256 }
  0xcb   : > { %1866 = vmatpush3.bf16.msra.mxu1 %v2134_v2  ;;  %1882 = vmatpush3.bf16.msra.mxu0 %v2140_v6  ;;  %v2153_v21 = vld [vmem:[#allocation11 + $0x8] sm:$0xff]   ;;  %v2154_v22 = vld [vmem:[#allocation11] sm:$0xff]   ;;  %v2878_v26 = vld [vmem:[%s3036_s8] sm:$0xf]  ;;  %p2410_p6 = scmp.ne.s32.totalorder %s2980_s23, %s2409_s5  ;;  %s2504_s19 = smov [#allocation16]  }
  0xcc   : > { %1871 = vmatprep.subr.bf16.mxu1 %v2501_v0  ;;  %1883 = vmatprep.subr.bf16.mxu0 %v2501_v0  ;;  %v539_v30 = vrot.slane %v2878_v26, %v538_v25  ;;  %v609_v32 = vrot.slane %v2878_v26, %v608_v28  ;;  %v530_v37 = vld [vmem:[%s458_s17] sm:$0xff]  ;;  %vm2892_vm5 = vmpackc.low %vm2503_vm4, %vm1792_vm3  ;;  %v2157_v61 = vld [vmem:[#allocation11 + $0xa8] sm:$0xff]   ;;  %p3102_p1 = scmp.ne.s32.totalorder %s3100_s24, 0  ;;  %s2413_s3 = sshll.u32 %s2504_s19, 4  ;;  %s2414_s3 = int_to_ptr.vmem [resolvable:$false] %s2413_s3 }
  0xcd   : > { %v680_v43 = vrot.slane %v530_v37, %v538_v25  ;;  %v2155_v52 = vld [vmem:[#allocation11 + $0xb8] sm:$0xff]   ;;  %v2156_v60 = vld [vmem:[#allocation11 + $0xb0] sm:$0xff]   ;;  %v2158_v62 = vld [vmem:[#allocation11 + $0xa0] sm:$0xff]   ;;  %v1036_v37 = vsub.s32 2, %v2872_v24  ;;  %s2415_s28 = scalar_lea.vmem %s2414_s3, 512  ;;  %p2416_p9 = scmp.lt.s32.totalorder %s2980_s23, %s2414_s3 }
  0xce   : > { %1868 = vmatmul.mubr.msk.bf16.vlgmr.msra.gmra.mxu1 %vm557_vm1, %v2135_v3  ;;  %v2159_v63 = vld [vmem:[#allocation11 + $0x98] sm:$0xff]   ;;  %v2160_v1 = vld [vmem:[#allocation11 + $0x90] sm:$0xff]   ;;  %v2161_v2 = vld [vmem:[#allocation11 + $0x88] sm:$0xff]   ;;  %v685_v3 = vadd.s32 8, %v2872_v24  ;;  %p2411_p4 = pnand %p2410_p6, %p3102_p1  ;;  %p2417_p10 = scmp.lt.s32.totalorder %s2415_s28, %s2409_s5 }
  0xcf   : > { %1872 = vmatpush3.bf16.msra.mxu1 %v2136_v4  ;;  %1875 = vmatprep.mubr.msk.bf16.mxu1 %vm2502_vm0, %v2501_v0  ;;  %v2162_v6 = vld [vmem:[#allocation11 + $0x80] sm:$0xff]   ;;  %v2175_v23 = vld [vmem:[#allocation13 + $0x10] sm:$0xff]   ;;  %v2185_v58 = vld [vmem:[#allocation13 + $0x88] sm:$0xff]   ;;  %s2985_s13 = scalar_lea.hbm %s3101_s10, %s1791_s11 }
  0xd0   : > { %1873 = vmatprep.subr.bf16.mxu1 %v2501_v0  ;;  %1884 = vmatpush3.bf16.msra.mxu0 %v2142_v9  ;;  %vm1793_vm7 = vcmp.ne.s32.totalorder %v685_v3, 15  ;;  %v2176_v25 = vld [vmem:[#allocation13 + $0x40] sm:$0xff]   ;;  %v2192_v9 = vld [vmem:[#allocation14 + $0x10] sm:$0xff]   ;;  %p2412_p11 = pneg %p2411_p4  ;;  %p2418_p12 = por %p2417_p10, %p2416_p9 }
  0xd1   : > { %1885 = vmatprep.subr.bf16.mxu0 %v2501_v0  ;;  %vm2916_vm8 = vmpackc.low %vm1793_vm7, %vm2503_vm4  ;;  %v2178_v28 = vld [vmem:[#allocation13] sm:$0xff]  }
  0xd2   : > { %v2186_v3 = vld [vmem:[#allocation13 + $0x80] sm:$0xff]   ;;  %p2419_p3 = pnand %p2418_p12, %p2412_p11 }
  0xd3   : > { %1874 = vmatpush3.bf16.msra.mxu1 %v2137_v7 }
  0xd4   : > { %1899 = vmatprep.subr.bf16.mxu1 %v2501_v0  ;;  %1886 = vmatpush3.bf16.msra.mxu0 %v2144_v12  ;;  %v2165_v12 = vld [vmem:[#allocation13 + $0x38] sm:$0xff]  }
  0xd5   : > { %1887 = vmatprep.subr.bf16.mxu0 %v2501_v0 }
  0xd6   : > { %1876 = vmatmul.mubr.msk.bf16.vlgmr.msra.gmra.mxu1 %vm557_vm1, %v2138_v8 }
  0xd7   : > { %1900 = vmatpush3.bf16.msra.mxu1 %v2141_v10  ;;  %1915 = vmatprep.mubr.msk.bf16.mxu1 %vm2502_vm0, %v2501_v0 }
  0xd8   : > { %1901 = vmatprep.subr.bf16.mxu1 %v2501_v0  ;;  %1888 = vmatpush3.bf16.msra.mxu0 %v2146_v14  ;;  %v2167_v14 = vld [vmem:[#allocation13 + $0x30] sm:$0xff]  }
  0xd9   : > { %1889 = vmatprep.subr.bf16.mxu0 %v2501_v0 }
  0xdb   : > { %1902 = vmatpush3.bf16.msra.mxu1 %v2143_v11  ;;  %v2163_v11 = vld [vmem:[#allocation13 + $0x78] sm:$0xff]  }
  0xdc   : > { %1903 = vmatprep.subr.bf16.mxu1 %v2501_v0  ;;  %1890 = vmatpush3.bf16.msra.mxu0 %v2148_v16  ;;  %v2169_v16 = vld [vmem:[#allocation13 + $0x28] sm:$0xff]  }
  0xdd   : > { %1891 = vmatprep.subr.bf16.mxu0 %v2501_v0 }
  0xdf   : > { %1904 = vmatpush3.bf16.msra.mxu1 %v2145_v13  ;;  %v2164_v13 = vld [vmem:[#allocation13 + $0x70] sm:$0xff]  }
  0xe0   : > { %1905 = vmatprep.subr.bf16.mxu1 %v2501_v0  ;;  %1892 = vmatpush3.bf16.msra.mxu0 %v2150_v18  ;;  %v2171_v18 = vld [vmem:[#allocation13 + $0x20] sm:$0xff]  }
  0xe1   : > { %1893 = vmatprep.subr.bf16.mxu0 %v2501_v0 }
  0xe3   : > { %1906 = vmatpush3.bf16.msra.mxu1 %v2147_v15  ;;  %v2166_v15 = vld [vmem:[#allocation13 + $0x68] sm:$0xff]  }
  0xe4   : > { %1907 = vmatprep.subr.bf16.mxu1 %v2501_v0  ;;  %1894 = vmatpush3.bf16.msra.mxu0 %v2152_v20  ;;  %v2172_v20 = vld [vmem:[#allocation13 + $0x50] sm:$0xff]  }
  0xe5   : > { %1919 = vmatprep.subr.bf16.mxu0 %v2501_v0 }
  0xe7   : > { %1908 = vmatpush3.bf16.msra.mxu1 %v2149_v17  ;;  %v2168_v17 = vld [vmem:[#allocation13 + $0x60] sm:$0xff]  }
  0xe8   : > { %1909 = vmatprep.subr.bf16.mxu1 %v2501_v0 }
  0xeb   : > { %1910 = vmatpush3.bf16.msra.mxu1 %v2151_v19  ;;  %v2170_v19 = vld [vmem:[#allocation13 + $0x58] sm:$0xff]  }
  0xec   : > { %1911 = vmatprep.subr.bf16.mxu1 %v2501_v0 }
  0xef   : > { %1912 = vmatpush3.bf16.msra.mxu1 %v2153_v21  ;;  %v2173_v21 = vld [vmem:[#allocation13 + $0x18] sm:$0xff]  }
  0xf0   : > { %1913 = vmatprep.subr.bf16.mxu1 %v2501_v0 }
  0xf3   : > { %1914 = vmatpush3.bf16.msra.mxu1 %v2154_v22  ;;  %v2174_v22 = vld [vmem:[#allocation13 + $0x48] sm:$0xff]  }
  0xf4   : > { %1939 = vmatprep.subr.bf16.mxu1 %v2501_v0 }
 0x18e   : > { %v595_v27 = vpop.f32.mrf.mxu1 }
 0x18f   : > { %v596_v34 = vadd.f32 %v595_v27, %v539_v30  ;;  %v2177_v27 = vld [vmem:[#allocation13 + $0x8] sm:$0xff]  }
 0x190   : > { %v1869_v29 = vpop.f32.mrf.mxu1 }
 0x191   : > { %v671_v39 = vmax.f32 %v596_v34, 0.0 }
 0x192   : > { %v598_v31 = vpop.f32.mrf.mxu1 }
 0x193   : > { %v599_v40 = vadd.f32 %v598_v31, %v539_v30 }
 0x194   : > { %v1870_v33 = vpop.f32.mrf.mxu1 }
 0x195   : > { %v672_v47 = vmax.f32 %v599_v40, 0.0 }
 0x196   : > { %v664_v35 = vpop.f32.mrf.mxu1 }
 0x197   : > { %v665_v36 = vadd.f32 %v664_v35, %v609_v32 }
 0x198   : > { %v1877_v38 = vpop.f32.mrf.mxu1 }
 0x199   : > { %v673_v41 = vmax.f32 %v665_v36, 0.0 }
 0x19a   : > { %v667_v42 = vpop.f32.mrf.mxu1 }
 0x19b   : > { %v675_v44 = vadd.f32 %v673_v41, %v671_v39  ;;  %v668_v45 = vadd.f32 %v667_v42, %v609_v32  ;;  %v1037_v39 = vrot.slane %v2878_v26, %v1036_v37 }
 0x19c   : > { %v1878_v46 = vpop.f32.mrf.mxu1 }
 0x19d   : > { %v674_v48 = vmax.f32 %v668_v45, 0.0  ;;  %v681_v49 = vadd.f32 %v680_v43, %v675_v44 }
 0x19f   : > { %v676_v50 = vadd.f32 %v674_v48, %v672_v47  ;;  %v690_v53 = vrot.slane %v681_v49, 7  ;;  %v701_v5 = vrot.slane %v681_v49, 1 }
 0x1a1   : > { %v682_v51 = vadd.f32 %v680_v43, %v676_v50 }
 0x1a3   : > { %v691_v54 = vrot.slane %v682_v51, 7  ;;  %v729_v55 = vpack.c.bf16 %v682_v51, %v681_v49  ;;  %v702_v4 = vrot.slane %v682_v51, 1  ;;  %v2179_v51 = vld [vmem:[#allocation13 + $0xb8] sm:$0xff]  }
 0x1a5   : > { %1896 = vmatmul.mubr.bf16.vlgmr.msra.gmra.mxu0 %v729_v55  ;;  %v693_v56 = vsel %vm692_vm2, %v690_v53, %v691_v54  ;;  %v694_v57 = vsel %vm692_vm2, %v691_v54, %v690_v53  ;;  %v704_v7 = vsel %vm703_vm6, %v701_v5, %v702_v4  ;;  %v705_v8 = vsel %vm703_vm6, %v702_v4, %v701_v5 }
 0x1a6   : > { %1920 = vmatpush3.bf16.msra.mxu0 %v2155_v52  ;;  %v1729_v59 = vpack.c.bf16 %v693_v56, %v694_v57  ;;  %1935 = vmatprep.mubr.msk.bf16.mxu0 %vm2502_vm0, %v2501_v0  ;;  %v1741_v10 = vpack.c.bf16 %v705_v8, %v704_v7  ;;  %v2187_v7 = vld [vmem:[#allocation14 + $0x38] sm:$0xff]   ;;  %v2188_v8 = vld [vmem:[#allocation14 + $0x30] sm:$0xff]  }
 0x1a7   : > { %1921 = vmatprep.subr.bf16.mxu0 %v2501_v0 }
 0x1a8   : > { %1916 = vmatmul.mubr.msk.bf16.vlgmr.msra.gmra.mxu1 %vm2892_vm5, %v1729_v59  ;;  %v2180_v59 = vld [vmem:[#allocation13 + $0xb0] sm:$0xff]  }
 0x1a9   : > { %1955 = vmatprep.mubr.msk.bf16.mxu1 %vm2502_vm0, %v2501_v0  ;;  %1940 = vmatpush3.bf16.msra.mxu1 %v2163_v11  ;;  %v2190_v11 = vld [vmem:[#allocation14 + $0x20] sm:$0xff]  }
 0x1aa   : > { %1922 = vmatpush3.bf16.msra.mxu0 %v2156_v60  ;;  %1941 = vmatprep.subr.bf16.mxu1 %v2501_v0  ;;  %v2181_v60 = vld [vmem:[#allocation13 + $0xa8] sm:$0xff]  }
 0x1ab   : > { %1923 = vmatprep.subr.bf16.mxu0 %v2501_v0 }
 0x1ad   : > { %1942 = vmatpush3.bf16.msra.mxu1 %v2164_v13  ;;  %v2193_v13 = vld [vmem:[#allocation14 + $0x8] sm:$0xff]  }
 0x1ae   : > { %1924 = vmatpush3.bf16.msra.mxu0 %v2157_v61  ;;  %1943 = vmatprep.subr.bf16.mxu1 %v2501_v0  ;;  %v2182_v61 = vld [vmem:[#allocation13 + $0xa0] sm:$0xff]  }
 0x1af   : > { %1925 = vmatprep.subr.bf16.mxu0 %v2501_v0 }
 0x1b1   : > { %1944 = vmatpush3.bf16.msra.mxu1 %v2166_v15 }
 0x1b2   : > { %1926 = vmatpush3.bf16.msra.mxu0 %v2158_v62  ;;  %1945 = vmatprep.subr.bf16.mxu1 %v2501_v0  ;;  %v2183_v62 = vld [vmem:[#allocation13 + $0x98] sm:$0xff]  }
 0x1b3   : > { %1927 = vmatprep.subr.bf16.mxu0 %v2501_v0 }
 0x1b5   : > { %1946 = vmatpush3.bf16.msra.mxu1 %v2168_v17 }
 0x1b6   : > { %1928 = vmatpush3.bf16.msra.mxu0 %v2159_v63  ;;  %1947 = vmatprep.subr.bf16.mxu1 %v2501_v0  ;;  %v2184_v63 = vld [vmem:[#allocation13 + $0x90] sm:$0xff]  }
 0x1b7   : > { %1929 = vmatprep.subr.bf16.mxu0 %v2501_v0 }
 0x1b9   : > { %1948 = vmatpush3.bf16.msra.mxu1 %v2170_v19 }
 0x1ba   : > { %1930 = vmatpush3.bf16.msra.mxu0 %v2160_v1  ;;  %1949 = vmatprep.subr.bf16.mxu1 %v2501_v0 }
 0x1bb   : > { %1931 = vmatprep.subr.bf16.mxu0 %v2501_v0 }
 0x1bd   : > { %1950 = vmatpush3.bf16.msra.mxu1 %v2172_v20 }
 0x1be   : > { %1932 = vmatpush3.bf16.msra.mxu0 %v2161_v2  ;;  %1951 = vmatprep.subr.bf16.mxu1 %v2501_v0 }
 0x1bf   : > { %1933 = vmatprep.subr.bf16.mxu0 %v2501_v0 }
 0x1c1   : > { %1952 = vmatpush3.bf16.msra.mxu1 %v2174_v22 }
 0x1c2   : > { %1934 = vmatpush3.bf16.msra.mxu0 %v2162_v6  ;;  %1953 = vmatprep.subr.bf16.mxu1 %v2501_v0 }
 0x1c3   : > { %1959 = vmatprep.subr.bf16.mxu0 %v2501_v0 }
 0x1c5   : > { %1936 = vmatmul.mubr.msk.bf16.vlgmr.msra.gmra.mxu0 %vm2916_vm8, %v1741_v10  ;;  %1954 = vmatpush3.bf16.msra.mxu1 %v2176_v25  ;;  %v2189_v10 = vld [vmem:[#allocation14 + $0x28] sm:$0xff]  }
 0x1c6   : > { %1975 = vmatprep.mubr.msk.bf16.mxu0 %vm2502_vm0, %v2501_v0  ;;  %1960 = vmatpush3.bf16.msra.mxu0 %v2165_v12  ;;  %v2191_v12 = vld [vmem:[#allocation14 + $0x18] sm:$0xff]  }
 0x1c7   : > { %1961 = vmatprep.subr.bf16.mxu0 %v2501_v0  ;;  %1979 = vmatprep.subr.bf16.mxu1 %v2501_v0 }
 0x1ca   : > { %1962 = vmatpush3.bf16.msra.mxu0 %v2167_v14  ;;  %v2194_v14 = vld [vmem:[#allocation14] sm:$0xff]  }
 0x1cb   : > { %1963 = vmatprep.subr.bf16.mxu0 %v2501_v0 }
 0x1ce   : > { %1964 = vmatpush3.bf16.msra.mxu0 %v2169_v16 }
 0x1cf   : > { %1965 = vmatprep.subr.bf16.mxu0 %v2501_v0 }
 0x1d2   : > { %1966 = vmatpush3.bf16.msra.mxu0 %v2171_v18 }
 0x1d3   : > { %1967 = vmatprep.subr.bf16.mxu0 %v2501_v0 }
 0x1d6   : > { %1968 = vmatpush3.bf16.msra.mxu0 %v2173_v21 }
 0x1d7   : > { %1969 = vmatprep.subr.bf16.mxu0 %v2501_v0 }
 0x1da   : > { %1970 = vmatpush3.bf16.msra.mxu0 %v2175_v23  ;;  %v1378_v23 = vsub.s32 3, %v2872_v24  ;;  %v1775_v24 = vld [vmem:[%s3037_s9] ss:$0 sm:$0xff] }
 0x1db   : > { %1971 = vmatprep.subr.bf16.mxu0 %v2501_v0 }
 0x1de   : > { %1972 = vmatpush3.bf16.msra.mxu0 %v2177_v27 }
 0x1df   : > { %1973 = vmatprep.subr.bf16.mxu0 %v2501_v0 }
 0x1e2   : > { %1974 = vmatpush3.bf16.msra.mxu0 %v2178_v28 }
 0x1e3   : > { %1999 = vmatprep.subr.bf16.mxu0 %v2501_v0 }
 0x265   : > { %v829_v29 = vpop.f32.mrf.mxu0 }
 0x267   : > { %v1897_v30 = vpop.f32.mrf.mxu0 }
 0x268   : > { %v918_v31 = vpop.f32.mrf.mxu1 }
 0x269   : > { %v832_v32 = vpop.f32.mrf.mxu0  ;;  %v919_v38 = vadd.f32 %v918_v31, %v829_v29  ;;  %v1379_v29 = vrot.slane %v2878_v26, %v1378_v23 }
 0x26a   : > { %v1917_v33 = vpop.f32.mrf.mxu1 }
 0x26b   : > { %v1898_v34 = vpop.f32.mrf.mxu0 }
 0x26c   : > { %v921_v35 = vpop.f32.mrf.mxu1 }
 0x26d   : > { %v922_v43 = vadd.f32 %v921_v35, %v832_v32 }
 0x26e   : > { %v1918_v36 = vpop.f32.mrf.mxu1 }
 0x285   : > { %v1025_v40 = vpop.f32.mrf.mxu0 }
 0x286   : > { %v1032_v41 = vadd.f32 %v1025_v40, %v919_v38 }
 0x287   : > { %v1937_v42 = vpop.f32.mrf.mxu0 }
 0x288   : > { %v1038_v44 = vadd.f32 %v1037_v39, %v1032_v41 }
 0x289   : > { %v1028_v45 = vpop.f32.mrf.mxu0 }
 0x28a   : > { %v1033_v46 = vadd.f32 %v1028_v45, %v922_v43  ;;  %v1040_v48 = vmax.f32 %v1038_v44, 0.0 }
 0x28b   : > { %v1938_v47 = vpop.f32.mrf.mxu0 }
 0x28c   : > { %v1039_v49 = vadd.f32 %v1037_v39, %v1033_v46  ;;  %v1042_v52 = vrot.slane %v1040_v48, 7  ;;  %v1048_v2 = vrot.slane %v1040_v48, 1 }
 0x28e   : > { %v1041_v50 = vmax.f32 %v1039_v49, 0.0 }
 0x290   : > { %v1043_v53 = vrot.slane %v1041_v50, 7  ;;  %v1071_v54 = vpack.c.bf16 %v1041_v50, %v1040_v48  ;;  %v1049_v1 = vrot.slane %v1041_v50, 1 }
 0x292   : > { %v1044_v55 = vsel %vm692_vm2, %v1042_v52, %v1043_v53  ;;  %v1045_v56 = vsel %vm692_vm2, %v1043_v53, %v1042_v52  ;;  %1956 = vmatmul.mubr.bf16.vlgmr.msra.gmra.mxu1 %v1071_v54  ;;  %v1050_v4 = vsel %vm703_vm6, %v1048_v2, %v1049_v1  ;;  %v1051_v5 = vsel %vm703_vm6, %v1049_v1, %v1048_v2 }
 0x293   : > { %1980 = vmatpush3.bf16.msra.mxu1 %v2179_v51  ;;  %v1761_v57 = vpack.c.bf16 %v1044_v55, %v1045_v56  ;;  %1995 = vmatprep.mubr.msk.bf16.mxu1 %vm2502_vm0, %v2501_v0  ;;  %v1773_v6 = vpack.c.bf16 %v1051_v5, %v1050_v4 }
 0x294   : > { %1981 = vmatprep.subr.bf16.mxu1 %v2501_v0 }
 0x295   : > { %1976 = vmatmul.mubr.msk.bf16.vlgmr.msra.gmra.mxu0 %vm2892_vm5, %v1761_v57 }
 0x296   : > { %2015 = vmatprep.mubr.msk.bf16.mxu0 %vm2502_vm0, %v2501_v0  ;;  %2000 = vmatpush3.bf16.msra.mxu0 %v2187_v7 }
 0x297   : > { %1982 = vmatpush3.bf16.msra.mxu1 %v2180_v59  ;;  %2001 = vmatprep.subr.bf16.mxu0 %v2501_v0 }
 0x298   : > { %1983 = vmatprep.subr.bf16.mxu1 %v2501_v0 }
 0x29a   : > { %2002 = vmatpush3.bf16.msra.mxu0 %v2188_v8 }
 0x29b   : > { %1984 = vmatpush3.bf16.msra.mxu1 %v2181_v60  ;;  %2003 = vmatprep.subr.bf16.mxu0 %v2501_v0 }
 0x29c   : > { %1985 = vmatprep.subr.bf16.mxu1 %v2501_v0 }
 0x29e   : > { %2004 = vmatpush3.bf16.msra.mxu0 %v2189_v10 }
 0x29f   : > { %1986 = vmatpush3.bf16.msra.mxu1 %v2182_v61  ;;  %2005 = vmatprep.subr.bf16.mxu0 %v2501_v0 }
 0x2a0   : > { %1987 = vmatprep.subr.bf16.mxu1 %v2501_v0 }
 0x2a2   : > { %2006 = vmatpush3.bf16.msra.mxu0 %v2190_v11 }
 0x2a3   : > { %1988 = vmatpush3.bf16.msra.mxu1 %v2183_v62  ;;  %2007 = vmatprep.subr.bf16.mxu0 %v2501_v0 }
 0x2a4   : > { %1989 = vmatprep.subr.bf16.mxu1 %v2501_v0 }
 0x2a6   : > { %2008 = vmatpush3.bf16.msra.mxu0 %v2191_v12 }
 0x2a7   : > { %1990 = vmatpush3.bf16.msra.mxu1 %v2184_v63  ;;  %2009 = vmatprep.subr.bf16.mxu0 %v2501_v0 }
 0x2a8   : > { %1991 = vmatprep.subr.bf16.mxu1 %v2501_v0 }
 0x2aa   : > { %2010 = vmatpush3.bf16.msra.mxu0 %v2192_v9 }
 0x2ab   : > { %1992 = vmatpush3.bf16.msra.mxu1 %v2185_v58  ;;  %2011 = vmatprep.subr.bf16.mxu0 %v2501_v0 }
 0x2ac   : > { %1993 = vmatprep.subr.bf16.mxu1 %v2501_v0 }
 0x2ae   : > { %2012 = vmatpush3.bf16.msra.mxu0 %v2193_v13 }
 0x2af   : > { %1994 = vmatpush3.bf16.msra.mxu1 %v2186_v3  ;;  %2013 = vmatprep.subr.bf16.mxu0 %v2501_v0 }
 0x2b2   : > { %1996 = vmatmul.mubr.msk.bf16.vlgmr.msra.gmra.mxu1 %vm2916_vm8, %v1773_v6  ;;  %2014 = vmatpush3.bf16.msra.mxu0 %v2194_v14 }
 0x352   : > { %v1171_v15 = vpop.f32.mrf.mxu1 }
 0x354   : > { %v1957_v16 = vpop.f32.mrf.mxu1 }
 0x355   : > { %v1260_v17 = vpop.f32.mrf.mxu0 }
 0x356   : > { %v1174_v18 = vpop.f32.mrf.mxu1  ;;  %v1261_v25 = vadd.f32 %v1260_v17, %v1171_v15 }
 0x357   : > { %v1977_v19 = vpop.f32.mrf.mxu0 }
 0x358   : > { %v1958_v20 = vpop.f32.mrf.mxu1 }
 0x359   : > { %v1263_v21 = vpop.f32.mrf.mxu0 }
 0x35a   : > { %v1264_v0 = vadd.f32 %v1263_v21, %v1174_v18 }
 0x35b   : > { %v1978_v22 = vpop.f32.mrf.mxu0 }
 0x372   : > { %v1367_v27 = vpop.f32.mrf.mxu1 }
 0x373   : > { %v1374_v28 = vadd.f32 %v1367_v27, %v1261_v25 }
 0x374   : > { %v1997_v30 = vpop.f32.mrf.mxu1 }
 0x375   : > { %v1380_v32 = vadd.f32 %v1379_v29, %v1374_v28 }
 0x376   : > { %v1370_v31 = vpop.f32.mrf.mxu1 }
 0x377   : > { %v1375_v33 = vadd.f32 %v1370_v31, %v1264_v0  ;;  %v1382_v36 = vmax.f32 %v1380_v32, 0.0 }
 0x378   : > { %v1998_v34 = vpop.f32.mrf.mxu1 }
 0x379   : > { %v1381_v35 = vadd.f32 %v1379_v29, %v1375_v33 }
 0x37b   : > { %v1383_v37 = vmax.f32 %v1381_v35, 0.0 }
 0x37d   : > { %v1384_v38 = vpack.c.bf16 %v1383_v37, %v1382_v36 }
 0x37f   : > { %2016 = vmatmul.mubr.bf16.vlgmr.msra.gmra.mxu0 %v1384_v38 }
 0x43f   : > { %v1490_v39 = vpop.f32.mrf.mxu0 }
 0x440   : > { %v1491_v26 = vadd.f32 %v1775_v24, %v1490_v39 }
 0x441   : > { %v2017_v40 = vpop.f32.mrf.mxu0 }
 0x442   : > { %1497 = vst [vmem:[%s524_s29] sm:$0xff] %v1491_v26 }
 0x443   : > { %v1493_v41 = vpop.f32.mrf.mxu0 }
 0x444   : > { %v1494_v42 = vadd.f32 %v1775_v24, %v1493_v41 }
 0x445   : > { %v2018_v43 = vpop.f32.mrf.mxu0 }
 0x446   : > { %1498 = vst [vmem:[%s524_s29 + $0x8] sm:$0xff] %v1494_v42 }
 0x447   : > { %2422 = shalt.err (!%p2419_p3)
}
 0x448   : > { %s2423_s20 = scalar_lea.hbm %s2985_s13, 256  ;;  %s2427_s17 = scalar_lea.hbm %s3101_s10, 512 }
 0x449   : > { %p2424_p2 = scmp.ne.s32.totalorder %s2985_s13, %s2423_s20  ;;  %p2428_p13 = scmp.lt.s32.totalorder %s2985_s13, %s3101_s10 }
 0x44a   : > { %p2429_p0 = scmp.lt.s32.totalorder %s2427_s17, %s2423_s20 }
 0x44b   : > { %p2425_p7 = pnand %p2424_p2, %p3102_p1 }
 0x44c   : > { %p2430_p5 = por %p2429_p0, %p2428_p13 }
 0x44d   : > { %p2426_p8 = pneg %p2425_p7 }
 0x44f   : > { %p2431_p6 = pnand %p2430_p5, %p2426_p8 }
 0x451   : > { %2434 = shalt.err (!%p2431_p6)
}
 0x452   : > { %s2505_s1 = smov 128   ;;  %s2506_s4 = smov 8  }
 0x453   : > { %2045 = dma.vmem_to_hbm [thread:$0]  (%p3102_p1), %s2980_s23, 256, %s2985_s13, %s1500_s26, %s2505_s1, %s2505_s1, %s2506_s4  }
 0x454 PF: > { %s3103_s27 = sld [smem:[#allocation23_spill]] }
 0x455   : > { %s3104_s29 = sld [smem:[#allocation28_spill]] }
 0x456   : > { %s3105_s11 = sld [smem:[#allocation24_spill]] }
 0x45a   : > { %s1528_s18 = sand.u32 1, %s3103_s27  }
 0x45b   : > { %p3106_p4 = scmp.ne.s32.totalorder %s3104_s29, 0  ;;  %s1529_s25 = scalar_lea.sflag [#allocation4], %s1528_s18 }
 0x45c   : > { %p3107_p11 = scmp.ge.s32.totalorder %s3105_s11, 2 }
 0x45e   : > { %p2074_p9 = pnand %p3107_p11, %p3106_p4 }
 0x460   : > { %p2075_p10 = pneg %p2074_p9 }
 0x462   : > { %2472 = dma.done.wait (%p2075_p10), %s1529_s25, 256  }
 0x463   : > { %2474 = vsyncadd (%p2075_p10), %s1529_s25, 4294967040  ;;  %s3108_s16 = sld [smem:[#allocation25_spill]]  ;;  %s3110_s13 = smov %s2481_s14 }
 0x464   : > { %s3109_s5 = sld [smem:[#allocation27_spill]]  ;;  %s3111_s14 = smov %s2485_s15 }
 0x469   : > { %p29_p12 = scmp.ge.s32.totalorder %s3108_s16, 4  }
 0x46a   : > { %s3112_s15 = smov %s3109_s5 }
 0x46b   :  { %31 = sbr.rel (!%p29_p12) target bundleno = 16 (0x10), region = 153 }
 0x470   :  { %1534 = vsyncpa [#allocation3], 1 }
 0x471   :  { %1536 = vsyncpa [#allocation3 + $0x1], 1 }
 0x472   :  { %1537 = vsyncpa [#allocation6], 1 }
 0x473   :  { %1539 = vsyncpa [#allocation6 + $0x1], 1 }
 0x474   :  { %1540 = vsyncpa [#allocation9], 1 }
 0x475   :  { %1541 = vsyncpa [#allocation12], 1 }
 0x476   :  { %1542 = vsyncpa [#allocation15], 1 }
 0x477   :  { %1543 = vsyncpa [#allocation4], 1 }
 0x478   :  { %1545 = vsyncpa [#allocation4 + $0x1], 1 }

</bundles_post_ra>
